<compile_context>
chip_gen: v7x
topology: tpu7x:2x2x1
jax: 0.10.0
libtpu: 0.0.40
codegen_flags: <defaults>
</compile_context>

<pallas_src>
import functools
import math

import jax
import jax.numpy as jnp
from jax.experimental import pallas as pl
from jax.experimental.pallas import tpu as pltpu

C = 384           # fixed by the module (GraphConvolution(384, 384))
N_BLOCKS = 17     # gc1 + 4*(outer gc + 3 layer gcs) ... + gc5
BN_EPS = 1e-5


# ---------------------------------------------------------------------------
# Fused Pallas kernel: one grid step == one GCN block
#   z = H @ (x @ W) -> (BN unless last block) -> (+skip if i % 4 != 0)
#     -> Softplus(beta=1, threshold=20)
# ---------------------------------------------------------------------------
def _hgcn_fused_kernel(feat_ref, h_ref, w_ref, g_ref, b_ref, o_ref, skip_ref):
    i = pl.program_id(0)
    n_blocks = pl.num_programs(0)
    B, N, Cc = o_ref.shape

    # Block 0 consumes the network input and zeroes the residual snapshot;
    # later blocks chain on the activation held resident in the output block.
    @pl.when(i == 0)
    def _():
        o_ref[...] = feat_ref[...]
        skip_ref[...] = jnp.zeros_like(skip_ref)

    x = o_ref[...]                      # (B, N, C) f32 activation of prev block
    w = w_ref[0]                        # (C, C) bf16 weight of this block

    # support = x @ W : single 2-D MXU matmul, bf16 inputs, f32 accumulate.
    support = jnp.dot(
        x.reshape(B * N, Cc).astype(jnp.bfloat16), w,
        preferred_element_type=jnp.float32,
    ).reshape(B, N, Cc)

    # z = H @ support : N is tiny (img_len), keep it off the MXU -> unrolled
    # broadcast-FMA on the VPU.  (Fallback to MXU einsum for large img_len.)
    h = h_ref[...]                      # (B, N, N) f32
    if N <= 16:
        z = h[:, :, 0:1] * support[:, 0:1, :]
        for m in range(1, N):
            z = z + h[:, :, m:m + 1] * support[:, m:m + 1, :]
    else:
        z = jnp.einsum("bnm,bmc->bnc", h, support,
                       preferred_element_type=jnp.float32)

    # BatchNorm1d(img_len) training-mode stats: per node over (B, C),
    # one-pass sum / sum-of-squares.  Applied to every block except the last.
    inv_cnt = 1.0 / (B * Cc)
    s1 = jnp.sum(jnp.sum(z, axis=2, keepdims=True), axis=0, keepdims=True)
    s2 = jnp.sum(jnp.sum(z * z, axis=2, keepdims=True), axis=0, keepdims=True)
    mean = s1 * inv_cnt
    var = s2 * inv_cnt - mean * mean
    z_bn = (z - mean) * jax.lax.rsqrt(var + BN_EPS) * g_ref[...] + b_ref[...]

    bn_gate = (i != n_blocks - 1).astype(jnp.float32)      # scalar 0/1
    z = bn_gate * z_bn + (1.0 - bn_gate) * z

    # Residual: HGCN_layer sub-blocks (i % 4 != 0) add the snapshot of the
    # enclosing layer's input feature.
    res_gate = (i % 4 != 0).astype(jnp.float32)             # scalar 0/1
    z = z + res_gate * skip_ref[...]

    # Softplus with PyTorch semantics (beta=1, threshold=20).
    act = jnp.where(z > 20.0, z, jnp.log1p(jnp.exp(jnp.minimum(z, 20.0))))

    o_ref[...] = act

    # Outer blocks (i % 4 == 0) define the residual for the next three blocks.
    @pl.when(i % 4 == 0)
    def _():
        skip_ref[...] = act


def hgcnnet_forward(feature, H, params):
    B, N, Cc = feature.shape
    w_all = params["w"].astype(jnp.bfloat16)      # (17, C, C) streamed in bf16
    gamma = params["gamma"]                       # (17, N, 1)
    beta = params["beta"]                         # (17, N, 1)
    n_blocks = w_all.shape[0]

    flops = n_blocks * (2 * B * N * Cc * Cc + 2 * B * N * N * Cc)
    transcendentals = n_blocks * (2 * B * N * Cc + B * N)
    bytes_accessed = (w_all.size * 2 + feature.size * 4 + H.size * 4 +
                      gamma.size * 4 + beta.size * 4 + B * N * Cc * 4)

    grid_spec = pltpu.PrefetchScalarGridSpec(
        num_scalar_prefetch=0,
        grid=(n_blocks,),
        in_specs=[
            pl.BlockSpec((B, N, Cc), lambda i: (0, 0, 0)),   # feature (resident)
            pl.BlockSpec((B, N, N), lambda i: (0, 0, 0)),    # adjacency (resident)
            pl.BlockSpec((1, Cc, Cc), lambda i: (i, 0, 0)),  # streamed weights
            pl.BlockSpec((1, N, 1), lambda i: (i, 0, 0)),    # BN gamma
            pl.BlockSpec((1, N, 1), lambda i: (i, 0, 0)),    # BN beta
        ],
        out_specs=pl.BlockSpec((B, N, Cc), lambda i: (0, 0, 0)),  # resident activation
        scratch_shapes=[pltpu.VMEM((B, N, Cc), jnp.float32)],     # residual snapshot
    )

    return pl.pallas_call(
        _hgcn_fused_kernel,
        out_shape=jax.ShapeDtypeStruct((B, N, Cc), jnp.float32),
        grid_spec=grid_spec,
        compiler_params=pltpu.CompilerParams(
            dimension_semantics=("arbitrary",)),
        cost_estimate=pl.CostEstimate(
            flops=flops, transcendentals=transcendentals,
            bytes_accessed=bytes_accessed),
    )(feature, H, w_all, gamma, beta)


# ---------------------------------------------------------------------------
# Parameter initialization (mirrors module __init__ shapes / defaults)
# ---------------------------------------------------------------------------
def init_params(key, img_len):
    xavier_std = math.sqrt(2.0 / (C + C))          # xavier_normal_ on (C, C)
    keys = jax.random.split(key, N_BLOCKS)
    w = jnp.stack([jax.random.normal(k, (C, C), jnp.float32) * xavier_std
                   for k in keys])                                  # (17, C, C)
    # torch BatchNorm1d default affine init: weight=1, bias=0 (entry 16 unused).
    gamma = jnp.ones((N_BLOCKS, img_len, 1), jnp.float32)
    beta = jnp.zeros((N_BLOCKS, img_len, 1), jnp.float32)
    # TODO(synk): BN running-mean/var buffers (momentum update) are not
    # materialized; the forward pass uses training-mode batch statistics only.
    return {"w": w, "gamma": gamma, "beta": beta}


# ---------------------------------------------------------------------------
# Pure-JAX references.  quantize=True models the kernel's intentional bf16
# MXU inputs (f32 accumulation) for a tight check; quantize=False is the full
# f32 reference, checked with a looser tolerance that bounds bf16 drift.
# ---------------------------------------------------------------------------
def _maybe_q(x, quantize):
    return x.astype(jnp.bfloat16).astype(jnp.float32) if quantize else x


def _ref_block(x, Hm, W, g, b, skip, use_bn, use_res, quantize):
    hp = jax.lax.Precision.HIGHEST
    s = jnp.einsum("bnk,kc->bnc", _maybe_q(x, quantize),
                   _maybe_q(W, quantize), precision=hp)
    z = jnp.einsum("bnm,bmc->bnc", Hm, s, precision=hp)
    if use_bn:
        m = jnp.mean(z, axis=(0, 2), keepdims=True)
        v = jnp.mean(z * z, axis=(0, 2), keepdims=True) - m * m
        z = (z - m) * jax.lax.rsqrt(v + BN_EPS) * g + b
    if use_res:
        z = z + skip
    return jnp.where(z > 20.0, z, jnp.log1p(jnp.exp(jnp.minimum(z, 20.0))))


def hgcnnet_reference(feature, H, params, quantize):
    x = feature
    skip = None
    for i in range(N_BLOCKS):
        use_bn = (i != N_BLOCKS - 1)
        use_res = (i % 4 != 0)
        x = _ref_block(x, H, params["w"][i], params["gamma"][i],
                       params["beta"][i], skip, use_bn, use_res, quantize)
        if i % 4 == 0:
            skip = x
    return x


# ---------------------------------------------------------------------------
if __name__ == "__main__":
    B, N = 2, 8                                   # batch=2, img_len=8, C=384
    key = jax.random.PRNGKey(0)
    k_feat, k_adj, k_par = jax.random.split(key, 3)

    feature = jax.random.normal(k_feat, (B, N, C), jnp.float32)
    # Row-stochastic adjacency (keeps activations well scaled).
    H = jax.nn.softmax(jax.random.normal(k_adj, (B, N, N), jnp.float32), axis=-1)
    params = init_params(k_par, N)

    fwd = jax.jit(hgcnnet_forward)
    out = jax.block_until_ready(fwd(feature, H, params))

    ref_q = jax.block_until_ready(hgcnnet_reference(feature, H, params, True))
    ref_f = jax.block_until_ready(hgcnnet_reference(feature, H, params, False))

    assert out.shape == (B, N, C)
    assert bool(jnp.all(jnp.isfinite(out)))
    # Tight check against the bf16-input / f32-accumulate model of the kernel.
    assert bool(jnp.allclose(out, ref_q, rtol=2e-2, atol=2e-2)), \
        f"max abs diff vs quantized ref {float(jnp.max(jnp.abs(out - ref_q)))}"
    # Loose check against the full-f32 reference (bounds total bf16 drift
    # accumulated through 17 stacked blocks).
    assert bool(jnp.allclose(out, ref_f, rtol=1e-1, atol=1e-1)), \
        f"max abs diff vs f32 ref {float(jnp.max(jnp.abs(out - ref_f)))}"

    print("KERNEL_OK")
</pallas_src>

<mosaic_0001>
module attributes {stable_mosaic.version = 11 : i64} {
  func.func @_hgcn_fused_kernel(%arg0: i32, %arg1: memref<2x8x384xf32, #tpu.memory_space<vmem>>, %arg2: memref<2x8x8xf32, #tpu.memory_space<vmem>>, %arg3: memref<1x384x384xbf16, #tpu.memory_space<vmem>>, %arg4: memref<1x8x1xf32, #tpu.memory_space<vmem>>, %arg5: memref<1x8x1xf32, #tpu.memory_space<vmem>>, %arg6: memref<2x8x384xf32, #tpu.memory_space<vmem>>, %arg7: memref<2x8x384xf32, #tpu.memory_space<vmem>>) attributes {dimension_semantics = [#tpu.dimension_semantics<arbitrary>], iteration_bounds = array<i64: 17>, scalar_prefetch = 0 : i64, scratch_operands = 1 : i64, tpu.core_type = #tpu.core_type<tc>, window_params = [{pipeline_mode = #tpu.pipeline_mode<synchronous>, transform_indices = @transform_0, window_bounds = array<i64: 2, 8, 384>}, {pipeline_mode = #tpu.pipeline_mode<synchronous>, transform_indices = @transform_1, window_bounds = array<i64: 2, 8, 8>}, {transform_indices = @transform_2, window_bounds = array<i64: 1, 384, 384>}, {transform_indices = @transform_3, window_bounds = array<i64: 1, 8, 1>}, {transform_indices = @transform_4, window_bounds = array<i64: 1, 8, 1>}, {pipeline_mode = #tpu.pipeline_mode<synchronous>, transform_indices = @transform_5, window_bounds = array<i64: 2, 8, 384>}]} {
    %c0_i32 = arith.constant 0 : i32
    %0 = arith.cmpi eq, %arg0, %c0_i32 : i32
    %1 = arith.extui %0 : i1 to i32
    %c0_i32_0 = arith.constant 0 : i32
    %2 = arith.cmpi ne, %1, %c0_i32_0 : i32
    scf.if %2 {
      %c0_44 = arith.constant 0 : index
      %c0_45 = arith.constant 0 : index
      %c0_46 = arith.constant 0 : index
      %133 = vector.load %arg1[%c0_44, %c0_45, %c0_46] : memref<2x8x384xf32, #tpu.memory_space<vmem>>, vector<2x8x384xf32>
      %c0_47 = arith.constant 0 : index
      %c0_48 = arith.constant 0 : index
      %c0_49 = arith.constant 0 : index
      %134 = vector.load %arg6[%c0_47, %c0_48, %c0_49] : memref<2x8x384xf32, #tpu.memory_space<vmem>>, vector<2x8x384xf32>
      tpu.vector_store %arg6[%c0_47, %c0_48, %c0_49], %133 {strides = array<i32>} : memref<2x8x384xf32, #tpu.memory_space<vmem>>, vector<2x8x384xf32>,
      %cst_50 = arith.constant 0.000000e+00 : f32
      %135 = vector.broadcast %cst_50 : f32 to vector<2x8x384xf32>
      %c0_51 = arith.constant 0 : index
      %c0_52 = arith.constant 0 : index
      %c0_53 = arith.constant 0 : index
      %136 = vector.load %arg7[%c0_51, %c0_52, %c0_53] : memref<2x8x384xf32, #tpu.memory_space<vmem>>, vector<2x8x384xf32>
      tpu.vector_store %arg7[%c0_51, %c0_52, %c0_53], %135 {strides = array<i32>} : memref<2x8x384xf32, #tpu.memory_space<vmem>>, vector<2x8x384xf32>,
    } else {
    }
    %c0 = arith.constant 0 : index
    %c0_1 = arith.constant 0 : index
    %c0_2 = arith.constant 0 : index
    %3 = vector.load %arg6[%c0, %c0_1, %c0_2] : memref<2x8x384xf32, #tpu.memory_space<vmem>>, vector<2x8x384xf32>
    %c0_3 = arith.constant 0 : index
    %c0_4 = arith.constant 0 : index
    %c0_5 = arith.constant 0 : index
    %4 = vector.load %arg3[%c0_3, %c0_4, %c0_5] : memref<1x384x384xbf16, #tpu.memory_space<vmem>>, vector<1x384x384xbf16>
    %5 = vector.shape_cast %4 : vector<1x384x384xbf16> to vector<384x384xbf16>
    %6 = vector.shape_cast %3 : vector<2x8x384xf32> to vector<16x384xf32>
    %7 = arith.truncf %6 : vector<16x384xf32> to vector<16x384xbf16>
    %cst = arith.constant dense<0.000000e+00> : vector<16x384xf32>
    %8 = tpu.matmul %7, %5, %cst {dimension_numbers = #tpu.dot_dimension_numbers<[1], [0], [0], [1], [0, 0, 1, 1], [], []>} : vector<16x384xbf16>, vector<384x384xbf16>, vector<16x384xf32> -> vector<16x384xf32>
    %9 = vector.shape_cast %8 : vector<16x384xf32> to vector<2x8x384xf32>
    %c0_6 = arith.constant 0 : index
    %c0_7 = arith.constant 0 : index
    %c0_8 = arith.constant 0 : index
    %10 = vector.load %arg2[%c0_6, %c0_7, %c0_8] : memref<2x8x8xf32, #tpu.memory_space<vmem>>, vector<2x8x8xf32>
    %11 = vector.extract_strided_slice %10 {offsets = [0, 0, 0], sizes = [2, 8, 1], strides = [1, 1, 1]} : vector<2x8x8xf32> to vector<2x8x1xf32>
    %12 = vector.extract_strided_slice %9 {offsets = [0, 0, 0], sizes = [2, 1, 384], strides = [1, 1, 1]} : vector<2x8x384xf32> to vector<2x1x384xf32>
    %13 = vector.broadcast %11 : vector<2x8x1xf32> to vector<2x8x384xf32>
    %14 = vector.broadcast %12 : vector<2x1x384xf32> to vector<2x8x384xf32>
    %15 = arith.mulf %13, %14 : vector<2x8x384xf32>
    %16 = vector.extract_strided_slice %10 {offsets = [0, 0, 1], sizes = [2, 8, 1], strides = [1, 1, 1]} : vector<2x8x8xf32> to vector<2x8x1xf32>
    %17 = vector.extract_strided_slice %9 {offsets = [0, 1, 0], sizes = [2, 1, 384], strides = [1, 1, 1]} : vector<2x8x384xf32> to vector<2x1x384xf32>
    %18 = vector.broadcast %16 : vector<2x8x1xf32> to vector<2x8x384xf32>
    %19 = vector.broadcast %17 : vector<2x1x384xf32> to vector<2x8x384xf32>
    %20 = arith.mulf %18, %19 : vector<2x8x384xf32>
    %21 = arith.addf %15, %20 : vector<2x8x384xf32>
    %22 = vector.extract_strided_slice %10 {offsets = [0, 0, 2], sizes = [2, 8, 1], strides = [1, 1, 1]} : vector<2x8x8xf32> to vector<2x8x1xf32>
    %23 = vector.extract_strided_slice %9 {offsets = [0, 2, 0], sizes = [2, 1, 384], strides = [1, 1, 1]} : vector<2x8x384xf32> to vector<2x1x384xf32>
    %24 = vector.broadcast %22 : vector<2x8x1xf32> to vector<2x8x384xf32>
    %25 = vector.broadcast %23 : vector<2x1x384xf32> to vector<2x8x384xf32>
    %26 = arith.mulf %24, %25 : vector<2x8x384xf32>
    %27 = arith.addf %21, %26 : vector<2x8x384xf32>
    %28 = vector.extract_strided_slice %10 {offsets = [0, 0, 3], sizes = [2, 8, 1], strides = [1, 1, 1]} : vector<2x8x8xf32> to vector<2x8x1xf32>
    %29 = vector.extract_strided_slice %9 {offsets = [0, 3, 0], sizes = [2, 1, 384], strides = [1, 1, 1]} : vector<2x8x384xf32> to vector<2x1x384xf32>
    %30 = vector.broadcast %28 : vector<2x8x1xf32> to vector<2x8x384xf32>
    %31 = vector.broadcast %29 : vector<2x1x384xf32> to vector<2x8x384xf32>
    %32 = arith.mulf %30, %31 : vector<2x8x384xf32>
    %33 = arith.addf %27, %32 : vector<2x8x384xf32>
    %34 = vector.extract_strided_slice %10 {offsets = [0, 0, 4], sizes = [2, 8, 1], strides = [1, 1, 1]} : vector<2x8x8xf32> to vector<2x8x1xf32>
    %35 = vector.extract_strided_slice %9 {offsets = [0, 4, 0], sizes = [2, 1, 384], strides = [1, 1, 1]} : vector<2x8x384xf32> to vector<2x1x384xf32>
    %36 = vector.broadcast %34 : vector<2x8x1xf32> to vector<2x8x384xf32>
    %37 = vector.broadcast %35 : vector<2x1x384xf32> to vector<2x8x384xf32>
    %38 = arith.mulf %36, %37 : vector<2x8x384xf32>
    %39 = arith.addf %33, %38 : vector<2x8x384xf32>
    %40 = vector.extract_strided_slice %10 {offsets = [0, 0, 5], sizes = [2, 8, 1], strides = [1, 1, 1]} : vector<2x8x8xf32> to vector<2x8x1xf32>
    %41 = vector.extract_strided_slice %9 {offsets = [0, 5, 0], sizes = [2, 1, 384], strides = [1, 1, 1]} : vector<2x8x384xf32> to vector<2x1x384xf32>
    %42 = vector.broadcast %40 : vector<2x8x1xf32> to vector<2x8x384xf32>
    %43 = vector.broadcast %41 : vector<2x1x384xf32> to vector<2x8x384xf32>
    %44 = arith.mulf %42, %43 : vector<2x8x384xf32>
    %45 = arith.addf %39, %44 : vector<2x8x384xf32>
    %46 = vector.extract_strided_slice %10 {offsets = [0, 0, 6], sizes = [2, 8, 1], strides = [1, 1, 1]} : vector<2x8x8xf32> to vector<2x8x1xf32>
    %47 = vector.extract_strided_slice %9 {offsets = [0, 6, 0], sizes = [2, 1, 384], strides = [1, 1, 1]} : vector<2x8x384xf32> to vector<2x1x384xf32>
    %48 = vector.broadcast %46 : vector<2x8x1xf32> to vector<2x8x384xf32>
    %49 = vector.broadcast %47 : vector<2x1x384xf32> to vector<2x8x384xf32>
    %50 = arith.mulf %48, %49 : vector<2x8x384xf32>
    %51 = arith.addf %45, %50 : vector<2x8x384xf32>
    %52 = vector.extract_strided_slice %10 {offsets = [0, 0, 7], sizes = [2, 8, 1], strides = [1, 1, 1]} : vector<2x8x8xf32> to vector<2x8x1xf32>
    %53 = vector.extract_strided_slice %9 {offsets = [0, 7, 0], sizes = [2, 1, 384], strides = [1, 1, 1]} : vector<2x8x384xf32> to vector<2x1x384xf32>
    %54 = vector.broadcast %52 : vector<2x8x1xf32> to vector<2x8x384xf32>
    %55 = vector.broadcast %53 : vector<2x1x384xf32> to vector<2x8x384xf32>
    %56 = arith.mulf %54, %55 : vector<2x8x384xf32>
    %57 = arith.addf %51, %56 : vector<2x8x384xf32>
    %cst_9 = arith.constant dense<0.000000e+00> : vector<2x8xf32>
    %58 = vector.multi_reduction <add>, %57, %cst_9 [2] : vector<2x8x384xf32> to vector<2x8xf32>
    %59 = vector.shape_cast %58 : vector<2x8xf32> to vector<2x8x1xf32>
    %cst_10 = arith.constant dense<0.000000e+00> : vector<8x1xf32>
    %60 = vector.multi_reduction <add>, %59, %cst_10 [0] : vector<2x8x1xf32> to vector<8x1xf32>
    %61 = vector.shape_cast %60 : vector<8x1xf32> to vector<1x8x1xf32>
    %62 = arith.mulf %57, %57 : vector<2x8x384xf32>
    %cst_11 = arith.constant dense<0.000000e+00> : vector<2x8xf32>
    %63 = vector.multi_reduction <add>, %62, %cst_11 [2] : vector<2x8x384xf32> to vector<2x8xf32>
    %64 = vector.shape_cast %63 : vector<2x8xf32> to vector<2x8x1xf32>
    %cst_12 = arith.constant dense<0.000000e+00> : vector<8x1xf32>
    %65 = vector.multi_reduction <add>, %64, %cst_12 [0] : vector<2x8x1xf32> to vector<8x1xf32>
    %66 = vector.shape_cast %65 : vector<8x1xf32> to vector<1x8x1xf32>
    %cst_13 = arith.constant 0.00130208337 : f32
    %67 = vector.broadcast %cst_13 : f32 to vector<1x8x1xf32>
    %68 = arith.mulf %61, %67 : vector<1x8x1xf32>
    %cst_14 = arith.constant 0.00130208337 : f32
    %69 = vector.broadcast %cst_14 : f32 to vector<1x8x1xf32>
    %70 = arith.mulf %66, %69 : vector<1x8x1xf32>
    %71 = arith.mulf %68, %68 : vector<1x8x1xf32>
    %72 = arith.subf %70, %71 : vector<1x8x1xf32>
    %73 = vector.broadcast %68 : vector<1x8x1xf32> to vector<2x8x384xf32>
    %74 = arith.subf %57, %73 : vector<2x8x384xf32>
    %cst_15 = arith.constant 9.99999974E-6 : f32
    %75 = vector.broadcast %cst_15 : f32 to vector<1x8x1xf32>
    %76 = arith.addf %72, %75 : vector<1x8x1xf32>
    %77 = math.rsqrt %76 : vector<1x8x1xf32>
    %78 = vector.broadcast %77 : vector<1x8x1xf32> to vector<2x8x384xf32>
    %79 = arith.mulf %74, %78 : vector<2x8x384xf32>
    %c0_16 = arith.constant 0 : index
    %c0_17 = arith.constant 0 : index
    %c0_18 = arith.constant 0 : index
    %80 = vector.load %arg4[%c0_16, %c0_17, %c0_18] : memref<1x8x1xf32, #tpu.memory_space<vmem>>, vector<1x8x1xf32>
    %81 = vector.broadcast %80 : vector<1x8x1xf32> to vector<2x8x384xf32>
    %82 = arith.mulf %79, %81 : vector<2x8x384xf32>
    %c0_19 = arith.constant 0 : index
    %c0_20 = arith.constant 0 : index
    %c0_21 = arith.constant 0 : index
    %83 = vector.load %arg5[%c0_19, %c0_20, %c0_21] : memref<1x8x1xf32, #tpu.memory_space<vmem>>, vector<1x8x1xf32>
    %84 = vector.broadcast %83 : vector<1x8x1xf32> to vector<2x8x384xf32>
    %85 = arith.addf %82, %84 : vector<2x8x384xf32>
    %c16_i32 = arith.constant 16 : i32
    %86 = arith.cmpi ne, %arg0, %c16_i32 : i32
    %87 = arith.extui %86 : i1 to i32
    %88 = arith.sitofp %87 : i32 to f32
    %89 = vector.broadcast %88 : f32 to vector<2x8x384xf32>
    %90 = arith.mulf %89, %85 : vector<2x8x384xf32>
    %cst_22 = arith.constant 1.000000e+00 : f32
    %91 = arith.subf %cst_22, %88 : f32
    %92 = vector.broadcast %91 : f32 to vector<2x8x384xf32>
    %93 = arith.mulf %92, %57 : vector<2x8x384xf32>
    %94 = arith.addf %90, %93 : vector<2x8x384xf32>
    %c4_i32 = arith.constant 4 : i32
    %c0_i32_23 = arith.constant 0 : i32
    %95 = arith.cmpi eq, %c4_i32, %c0_i32_23 : i32
    %c1_i32 = arith.constant 1 : i32
    %96 = arith.select %95, %c1_i32, %c4_i32 : i32
    %97 = arith.remsi %arg0, %96 : i32
    %c0_i32_24 = arith.constant 0 : i32
    %98 = arith.cmpi ne, %97, %c0_i32_24 : i32
    %c0_i32_25 = arith.constant 0 : i32
    %99 = arith.cmpi slt, %97, %c0_i32_25 : i32
    %c0_i32_26 = arith.constant 0 : i32
    %100 = arith.cmpi slt, %96, %c0_i32_26 : i32
    %101 = arith.xori %99, %100 : i1
    %102 = arith.andi %101, %98 : i1
    %103 = arith.addi %97, %96 : i32
    %104 = arith.select %102, %103, %97 : i32
    %c0_i32_27 = arith.constant 0 : i32
    %105 = arith.cmpi ne, %104, %c0_i32_27 : i32
    %106 = arith.extui %105 : i1 to i32
    %107 = arith.sitofp %106 : i32 to f32
    %c0_28 = arith.constant 0 : index
    %c0_29 = arith.constant 0 : index
    %c0_30 = arith.constant 0 : index
    %108 = vector.load %arg7[%c0_28, %c0_29, %c0_30] : memref<2x8x384xf32, #tpu.memory_space<vmem>>, vector<2x8x384xf32>
    %109 = vector.broadcast %107 : f32 to vector<2x8x384xf32>
    %110 = arith.mulf %109, %108 : vector<2x8x384xf32>
    %111 = arith.addf %94, %110 : vector<2x8x384xf32>
    %cst_31 = arith.constant 2.000000e+01 : f32
    %112 = vector.broadcast %cst_31 : f32 to vector<2x8x384xf32>
    %113 = arith.cmpf ogt, %111, %112 : vector<2x8x384xf32>
    %cst_32 = arith.constant 2.000000e+01 : f32
    %114 = vector.broadcast %cst_32 : f32 to vector<2x8x384xf32>
    %115 = arith.minimumf %111, %114 : vector<2x8x384xf32>
    %116 = math.exp %115 : vector<2x8x384xf32>
    %117 = math.log1p %116 : vector<2x8x384xf32>
    %118 = arith.select %113, %111, %117 : vector<2x8x384xi1>, vector<2x8x384xf32>
    %c0_33 = arith.constant 0 : index
    %c0_34 = arith.constant 0 : index
    %c0_35 = arith.constant 0 : index
    %119 = vector.load %arg6[%c0_33, %c0_34, %c0_35] : memref<2x8x384xf32, #tpu.memory_space<vmem>>, vector<2x8x384xf32>
    tpu.vector_store %arg6[%c0_33, %c0_34, %c0_35], %118 {strides = array<i32>} : memref<2x8x384xf32, #tpu.memory_space<vmem>>, vector<2x8x384xf32>,
    %c4_i32_36 = arith.constant 4 : i32
    %c0_i32_37 = arith.constant 0 : i32
    %120 = arith.cmpi eq, %c4_i32_36, %c0_i32_37 : i32
    %c1_i32_38 = arith.constant 1 : i32
    %121 = arith.select %120, %c1_i32_38, %c4_i32_36 : i32
    %122 = arith.remsi %arg0, %121 : i32
    %c0_i32_39 = arith.constant 0 : i32
    %123 = arith.cmpi ne, %122, %c0_i32_39 : i32
    %c0_i32_40 = arith.constant 0 : i32
    %124 = arith.cmpi slt, %122, %c0_i32_40 : i32
    %c0_i32_41 = arith.constant 0 : i32
    %125 = arith.cmpi slt, %121, %c0_i32_41 : i32
    %126 = arith.xori %124, %125 : i1
    %127 = arith.andi %126, %123 : i1
    %128 = arith.addi %122, %121 : i32
    %129 = arith.select %127, %128, %122 : i32
    %c0_i32_42 = arith.constant 0 : i32
    %130 = arith.cmpi eq, %129, %c0_i32_42 : i32
    %131 = arith.extui %130 : i1 to i32
    %c0_i32_43 = arith.constant 0 : i32
    %132 = arith.cmpi ne, %131, %c0_i32_43 : i32
    scf.if %132 {
      %c0_44 = arith.constant 0 : index
      %c0_45 = arith.constant 0 : index
      %c0_46 = arith.constant 0 : index
      %133 = vector.load %arg7[%c0_44, %c0_45, %c0_46] : memref<2x8x384xf32, #tpu.memory_space<vmem>>, vector<2x8x384xf32>
      tpu.vector_store %arg7[%c0_44, %c0_45, %c0_46], %118 {strides = array<i32>} : memref<2x8x384xf32, #tpu.memory_space<vmem>>, vector<2x8x384xf32>,
    } else {
    }
    return
  }
  func.func @transform_0(%arg0: i32) -> (i32, i32, i32) {
    %c0_i32 = arith.constant 0 : i32
    %c0_i32_0 = arith.constant 0 : i32
    %c0_i32_1 = arith.constant 0 : i32
    %c0_i32_2 = arith.constant 0 : i32
    return %c0_i32, %c0_i32_0, %c0_i32_1 : i32, i32, i32
  }
  func.func @transform_1(%arg0: i32) -> (i32, i32, i32) {
    %c0_i32 = arith.constant 0 : i32
    %c0_i32_0 = arith.constant 0 : i32
    %c0_i32_1 = arith.constant 0 : i32
    %c0_i32_2 = arith.constant 0 : i32
    return %c0_i32, %c0_i32_0, %c0_i32_1 : i32, i32, i32
  }
  func.func @transform_2(%arg0: i32) -> (i32, i32, i32) {
    %c0_i32 = arith.constant 0 : i32
    %c0_i32_0 = arith.constant 0 : i32
    %c0_i32_1 = arith.constant 0 : i32
    return %arg0, %c0_i32, %c0_i32_0 : i32, i32, i32
  }
  func.func @transform_3(%arg0: i32) -> (i32, i32, i32) {
    %c0_i32 = arith.constant 0 : i32
    %c0_i32_0 = arith.constant 0 : i32
    %c0_i32_1 = arith.constant 0 : i32
    return %arg0, %c0_i32, %c0_i32_0 : i32, i32, i32
  }
  func.func @transform_4(%arg0: i32) -> (i32, i32, i32) {
    %c0_i32 = arith.constant 0 : i32
    %c0_i32_0 = arith.constant 0 : i32
    %c0_i32_1 = arith.constant 0 : i32
    return %arg0, %c0_i32, %c0_i32_0 : i32, i32, i32
  }
  func.func @transform_5(%arg0: i32) -> (i32, i32, i32) {
    %c0_i32 = arith.constant 0 : i32
    %c0_i32_0 = arith.constant 0 : i32
    %c0_i32_1 = arith.constant 0 : i32
    %c0_i32_2 = arith.constant 0 : i32
    return %c0_i32, %c0_i32_0, %c0_i32_1 : i32, i32, i32
  }
}

</mosaic_0001>

<bundles_post_ra>
// kernel: hgcnnet_forward.1
= control target key start
LH: loop header
LB: loop body
LE: loop exit
PB: predicated region body
PF: predicated region fallthrough
CT: control target
= control target key end

     0   :  { %10 = vsyncpa [#allocation4], 0  ;;  %s1961_s18 = smov 0   ;;  %s2455_s0 = inlined_call_operand.vmem [shape: f32[2,8,384], index: 0, kind: input, shape index: {}]   ;;  %s2456_s1 = inlined_call_operand.vmem [shape: f32[2,8,8], index: 1, kind: input, shape index: {}]   ;;  %s2457_s2 = inlined_call_operand.vmem [shape: bf16[17,384,384], index: 2, kind: input, shape index: {}]   ;;  %s2458_s3 = inlined_call_operand.vmem [shape: f32[17,8,1], index: 3, kind: input, shape index: {}]   ;;  %s2459_s4 = inlined_call_operand.vmem [shape: f32[17,8,1], index: 4, kind: input, shape index: {}]   ;;  %s2460_s5 = inlined_call_operand.hbm [shape: f32[2,8,384], index: 5, kind: output, shape index: {}]  }
   0x1 LB: > { %s1967_s19 = sadd.s32 4294967295, %s1915_s18   ;;  %p1574_p0 = scmp.ge.s32.totalorder %s1915_s18, 1  ;;  %s1915_s18 = sphi %s1961_s18, %s16_s18  }
   0x2   : > { %p201_p1 = scmp.lt.s32.totalorder %s1915_s18, 18 }
   0x4   : > { %p202_p2 = pnand %p1574_p0, %p201_p1 }
   0x5   : > { %p232_p3 = scmp.lt.s32.totalorder (!%p202_p2), %s1967_s19, 16  ;;  %p1578_p4 = scmp.ne.s32.totalorder (!%p202_p2), %s1967_s19, 0 }
   0x6   : > { %205 = sbr.rel (%p202_p2) target bundleno = 601 (0x259), region = 40 }
   0xd   : > { %s233_s20 = scalar_select %p232_p3, %s1967_s19, 16 }
   0xe   : > { %249 = sbr.rel (%p1578_p4) target bundleno = 21 (0x15), region = 44  ;;  %v250_v0 = vld [vmem:[%s2455_s0] sm:$0xff] (!%p1578_p4)  ;;  %v251_v1 = vld [vmem:[%s2455_s0 + $0x8] sm:$0xff] (!%p1578_p4)  ;;  %v252_v2 = vld [vmem:[%s2455_s0 + $0x10] sm:$0xff] (!%p1578_p4)  ;;  %v1917_v6 = vmov (!%p1578_p4), 0.0  }
   0xf   : > { %s1714_s21 = smul.u32 576, %s233_s20  ;;  %s1576_s22 = sshll.u32 %s233_s20, 3  ;;  %256 = vst [vmem:[#allocation3] sm:$0xff] (!%p1578_p4), %v250_v0  ;;  %257 = vst [vmem:[#allocation3 + $0x8] sm:$0xff] (!%p1578_p4), %v251_v1  ;;  %v253_v3 = vld [vmem:[%s2455_s0 + $0x18] sm:$0xff] (!%p1578_p4)  ;;  %v254_v4 = vld [vmem:[%s2455_s0 + $0x20] sm:$0xff] (!%p1578_p4) }
  0x10   : > { %s1976_s25 = scalar_lea.vmem %s2458_s3, %s1576_s22  ;;  %s1981_s28 = scalar_lea.vmem %s2459_s4, %s1576_s22  ;;  %258 = vst [vmem:[#allocation3 + $0x10] sm:$0xff] (!%p1578_p4), %v252_v2  ;;  %v255_v5 = vld [vmem:[%s2455_s0 + $0x28] sm:$0xff] (!%p1578_p4)  ;;  %262 = vst [vmem:[#allocation2] sm:$0xff] (!%p1578_p4), %v1917_v6 }
  0x11   : > { %s1986_s6 = scalar_lea.vmem %s2457_s2, %s1714_s21  ;;  %263 = vst [vmem:[#allocation2 + $0x8] sm:$0xff] (!%p1578_p4), %v1917_v6  ;;  %264 = vst [vmem:[#allocation2 + $0x10] sm:$0xff] (!%p1578_p4), %v1917_v6 }
  0x12   : > { %265 = vst [vmem:[#allocation2 + $0x18] sm:$0xff] (!%p1578_p4), %v1917_v6  ;;  %266 = vst [vmem:[#allocation2 + $0x20] sm:$0xff] (!%p1578_p4), %v1917_v6 }
  0x13   : > { %267 = vst [vmem:[#allocation2 + $0x28] sm:$0xff] (!%p1578_p4), %v1917_v6  ;;  %259 = vst [vmem:[#allocation3 + $0x18] sm:$0xff] (!%p1578_p4), %v253_v3 }
  0x14   : > { %260 = vst [vmem:[#allocation3 + $0x20] sm:$0xff] (!%p1578_p4), %v254_v4  ;;  %261 = vst [vmem:[#allocation3 + $0x28] sm:$0xff] (!%p1578_p4), %v255_v5 }
  0x15 PF: > { %v1757_v7 = vld [vmem:[%s1986_s6 + $0x4] ss:$12 sps:$4 sm:$0xff]   ;;  %v1759_v8 = vld [vmem:[%s1986_s6 + $0xc8] ss:$12 sps:$4 sm:$0xff]   ;;  %v1760_v9 = vld [vmem:[%s1986_s6] ss:$12 sps:$4 sm:$0xff]  }
  0x16   : > { %757 = vmatprep.subr.bf16.mxu0 %v1757_v7  ;;  %1659 = vmatprep.subr.bf16.mxu1 %v1759_v8  ;;  %v1761_v10 = vld [vmem:[%s1986_s6 + $0x8] ss:$12 sps:$4 sm:$0xff]   ;;  %v1918_v12 = vmov 1   ;;  %v1764_v13 = vld [vmem:[%s1986_s6 + $0xe0] ss:$12 sps:$4 sm:$0xff]   ;;  %v1919_v15 = vmov 0  }
  0x17   : > { %758 = vmatpush1.bf16.msra.mxu0 %v1760_v9  ;;  %v1762_v11 = vld [vmem:[%s1986_s6 + $0x1c] ss:$12 sps:$4 sm:$0xff]   ;;  %1744 = vset.pattern.permute.xlu1 %v1918_v12  ;;  %v1765_v14 = vld [vmem:[%s1986_s6 + $0x18] ss:$12 sps:$4 sm:$0xff]   ;;  %v1766_v16 = vld [vmem:[%s1986_s6 + $0x20] ss:$12 sps:$4 sm:$0xff]  }
  0x18   : > { %1660 = vmatpush3.bf16.msra.mxu1 %v1761_v10  ;;  %1743 = vset.pattern.permute.xlu0 %v1919_v15  ;;  %v1767_v17 = vld [vmem:[%s1986_s6 + $0x34] ss:$12 sps:$4 sm:$0xff]   ;;  %v1769_v18 = vld [vmem:[%s1986_s6 + $0xf8] ss:$12 sps:$4 sm:$0xff]   ;;  %v1770_v19 = vld [vmem:[%s1986_s6 + $0x30] ss:$12 sps:$4 sm:$0xff]  }
  0x19   : > { %759 = vmatprep.subr.bf16.mxu0 %v1762_v11  ;;  %1661 = vmatprep.subr.bf16.mxu1 %v1764_v13  ;;  %v1771_v20 = vld [vmem:[%s1986_s6 + $0x38] ss:$12 sps:$4 sm:$0xff]   ;;  %v1774_v22 = vld [vmem:[%s1986_s6 + $0x110] ss:$12 sps:$4 sm:$0xff]   ;;  %v1775_v23 = vld [vmem:[%s1986_s6 + $0x48] ss:$12 sps:$4 sm:$0xff]  }
  0x1a   : > { %v1772_v21 = vld [vmem:[%s1986_s6 + $0x4c] ss:$12 sps:$4 sm:$0xff]   ;;  %v1776_v24 = vld [vmem:[%s1986_s6 + $0x50] ss:$12 sps:$4 sm:$0xff]   ;;  %v1779_v26 = vld [vmem:[%s1986_s6 + $0x128] ss:$12 sps:$4 sm:$0xff]  }
  0x1b   : > { %760 = vmatpush1.bf16.msra.mxu0 %v1765_v14  ;;  %v1777_v25 = vld [vmem:[%s1986_s6 + $0x64] ss:$12 sps:$4 sm:$0xff]   ;;  %v1780_v27 = vld [vmem:[%s1986_s6 + $0x60] ss:$12 sps:$4 sm:$0xff]   ;;  %v1781_v28 = vld [vmem:[%s1986_s6 + $0x68] ss:$12 sps:$4 sm:$0xff]  }
  0x1c   : > { %1662 = vmatpush3.bf16.msra.mxu1 %v1766_v16  ;;  %761 = vmatprep.subr.bf16.mxu0 %v1767_v17  ;;  %v1782_v29 = vld [vmem:[%s1986_s6 + $0x7c] ss:$12 sps:$4 sm:$0xff]   ;;  %v1784_v30 = vld [vmem:[%s1986_s6 + $0x140] ss:$12 sps:$4 sm:$0xff]   ;;  %v1785_v31 = vld [vmem:[%s1986_s6 + $0x78] ss:$12 sps:$4 sm:$0xff]  }
  0x1d   : > { %1663 = vmatprep.subr.bf16.mxu1 %v1769_v18  ;;  %v1786_v32 = vld [vmem:[%s1986_s6 + $0x80] ss:$12 sps:$4 sm:$0xff]   ;;  %v1789_v34 = vld [vmem:[%s1986_s6 + $0x158] ss:$12 sps:$4 sm:$0xff]   ;;  %v1790_v35 = vld [vmem:[%s1986_s6 + $0x90] ss:$12 sps:$4 sm:$0xff]  }
  0x1e   : > { %v1787_v33 = vld [vmem:[%s1986_s6 + $0x94] ss:$12 sps:$4 sm:$0xff]   ;;  %v1791_v36 = vld [vmem:[%s1986_s6 + $0x98] ss:$12 sps:$4 sm:$0xff]   ;;  %v1794_v38 = vld [vmem:[%s1986_s6 + $0x170] ss:$12 sps:$4 sm:$0xff]  }
  0x1f   : > { %762 = vmatpush1.bf16.msra.mxu0 %v1770_v19  ;;  %v1792_v37 = vld [vmem:[%s1986_s6 + $0xac] ss:$12 sps:$4 sm:$0xff]   ;;  %v1795_v39 = vld [vmem:[%s1986_s6 + $0xa8] ss:$12 sps:$4 sm:$0xff]   ;;  %v1796_v40 = vld [vmem:[%s1986_s6 + $0xb0] ss:$12 sps:$4 sm:$0xff]  }
  0x20   : > { %1664 = vmatpush3.bf16.msra.mxu1 %v1771_v20  ;;  %763 = vmatprep.subr.bf16.mxu0 %v1772_v21  ;;  %v269_v41 = vld [vmem:[#allocation3 + $0x8] sm:$0xff]  ;;  %v1797_v42 = vld [vmem:[%s1986_s6 + $0xc4] ss:$12 sps:$4 sm:$0xff]   ;;  %v271_v46 = vld [vmem:[#allocation3 + $0x18] sm:$0xff]  ;;  %v1920_v51 = vmov 0.0   ;;  %vm1921_vm0 = vmmov 0  }
  0x21   : > { %1665 = vmatprep.subr.bf16.mxu1 %v1774_v22  ;;  %v272_v43 = vld [vmem:[#allocation3 + $0x20] sm:$0xff]  ;;  %v1799_v47 = vld [vmem:[%s1986_s6 + $0xc0] ss:$12 sps:$4 sm:$0xff]   ;;  %v1801_v50 = vld [vmem:[%s1986_s6 + $0xdc] ss:$12 sps:$4 sm:$0xff]   ;;  %v1922_v17 = vmov 2  }
  0x22   : > { %v268_v44 = vld [vmem:[#allocation3] sm:$0xff]  ;;  %v371_v45 = vpack.c.bf16 %v272_v43, %v269_v41  ;;  %v1803_v52 = vld [vmem:[%s1986_s6 + $0xd8] ss:$12 sps:$4 sm:$0xff]   ;;  %v1804_v53 = vld [vmem:[%s1986_s6 + $0x1a0] ss:$12 sps:$4 sm:$0xff]   ;;  %v1923_v22 = vmov 3  }
  0x23   : > { %764 = vmatpush1.bf16.msra.mxu0 %v1775_v23  ;;  %v2042_v48 = vpack.c.bf16 %v271_v46, %v268_v44  ;;  %v1800_v49 = vld [vmem:[%s1986_s6 + $0x188] ss:$12 sps:$4 sm:$0xff]   ;;  %v1807_v55 = vld [vmem:[%s1986_s6 + $0xf0] ss:$12 sps:$4 sm:$0xff]   ;;  %v1808_v56 = vld [vmem:[%s1986_s6 + $0x1b8] ss:$12 sps:$4 sm:$0xff]   ;;  %v937_v44 = vlaneseq }
  0x24   : > { %1666 = vmatpush3.bf16.msra.mxu1 %v1776_v24  ;;  %765 = vmatprep.subr.bf16.mxu0 %v1777_v25  ;;  %v1805_v54 = vld [vmem:[%s1986_s6 + $0xf4] ss:$12 sps:$4 sm:$0xff]   ;;  %v1809_v57 = vld [vmem:[%s1986_s6 + $0x10c] ss:$12 sps:$4 sm:$0xff]   ;;  %v1812_v59 = vld [vmem:[%s1986_s6 + $0x1d0] ss:$12 sps:$4 sm:$0xff]  }
  0x25   : > { %1667 = vmatprep.subr.bf16.mxu1 %v1779_v26  ;;  %875 = vmatprep.mubr.bf16.mxu1 %v371_v45  ;;  %v1811_v58 = vld [vmem:[%s1986_s6 + $0x108] ss:$12 sps:$4 sm:$0xff]   ;;  %v1813_v60 = vld [vmem:[%s1986_s6 + $0x124] ss:$12 sps:$4 sm:$0xff]   ;;  %v1815_v61 = vld [vmem:[%s1986_s6 + $0x120] ss:$12 sps:$4 sm:$0xff]  }
  0x26   : > { %789 = vmatprep.mubr.bf16.mxu0 %v371_v45  ;;  %v1816_v62 = vld [vmem:[%s1986_s6 + $0x1e8] ss:$12 sps:$4 sm:$0xff]   ;;  %v1819_v0 = vld [vmem:[%s1986_s6 + $0x138] ss:$12 sps:$4 sm:$0xff]   ;;  %v1820_v1 = vld [vmem:[%s1986_s6 + $0x200] ss:$12 sps:$4 sm:$0xff]  }
  0x27   : > { %766 = vmatpush1.bf16.msra.mxu0 %v1780_v27  ;;  %v1817_v63 = vld [vmem:[%s1986_s6 + $0x13c] ss:$12 sps:$4 sm:$0xff]   ;;  %v1821_v2 = vld [vmem:[%s1986_s6 + $0x154] ss:$12 sps:$4 sm:$0xff]   ;;  %v1824_v4 = vld [vmem:[%s1986_s6 + $0x218] ss:$12 sps:$4 sm:$0xff]  }
  0x28   : > { %1668 = vmatpush3.bf16.msra.mxu1 %v1781_v28  ;;  %767 = vmatprep.subr.bf16.mxu0 %v1782_v29  ;;  %v1823_v3 = vld [vmem:[%s1986_s6 + $0x150] ss:$12 sps:$4 sm:$0xff]   ;;  %v1825_v5 = vld [vmem:[%s1986_s6 + $0x16c] ss:$12 sps:$4 sm:$0xff]   ;;  %v2068_v6 = vld [vmem:[%s2456_s1] sm:$0xff]  ;;  %v1924_v25 = vmov 4  }
  0x29   : > { %1669 = vmatprep.subr.bf16.mxu1 %v1784_v30  ;;  %968 = vperm.xlu1 %1744, %v2068_v6   ;;  %v1827_v7 = vld [vmem:[%s1986_s6 + $0x168] ss:$12 sps:$4 sm:$0xff]   ;;  %v1828_v8 = vld [vmem:[%s1986_s6 + $0x230] ss:$12 sps:$4 sm:$0xff]   ;;  %v270_v11 = vld [vmem:[#allocation3 + $0x10] sm:$0xff]  ;;  %v1925_v28 = vmov 5  }
  0x2a   : > { %929 = vperm.xlu0 %1743, %v2068_v6   ;;  %v2077_v9 = vld [vmem:[%s2456_s1 + $0x8] sm:$0xff]  ;;  %v1831_v10 = vld [vmem:[%s1986_s6 + $0x184] ss:$12 sps:$4 sm:$0xff]   ;;  %v273_v12 = vld [vmem:[#allocation3 + $0x28] sm:$0xff]  ;;  %v938_v46 = vshrl.u32 %v937_v44, 7  ;;  %s1366_s26 = ssub.s32 0, %s1967_s19 }
  0x2b   : > { %768 = vmatpush1.bf16.msra.mxu0 %v1785_v31  ;;  %v1829_v13 = vld [vmem:[%s1986_s6 + $0x180] ss:$12 sps:$4 sm:$0xff]   ;;  %v372_v14 = vpack.c.bf16 %v273_v12, %v270_v11  ;;  %v1834_v16 = vld [vmem:[%s1986_s6 + $0x19c] ss:$12 sps:$4 sm:$0xff]   ;;  %v1832_v18 = vld [vmem:[%s1986_s6 + $0x198] ss:$12 sps:$4 sm:$0xff]   ;;  %s1651_s27 = smin.u32 %s1967_s19, %s1366_s26 }
  0x2c   : > { %1670 = vmatpush3.bf16.msra.mxu1 %v1786_v32  ;;  %769 = vmatprep.subr.bf16.mxu0 %v1787_v33  ;;  %v1837_v19 = vld [vmem:[%s1986_s6 + $0x1b4] ss:$12 sps:$4 sm:$0xff]   ;;  %v1835_v20 = vld [vmem:[%s1986_s6 + $0x1b0] ss:$12 sps:$4 sm:$0xff]   ;;  %v1840_v21 = vld [vmem:[%s1986_s6 + $0x1cc] ss:$12 sps:$4 sm:$0xff]  }
  0x2d   : > { %1671 = vmatprep.subr.bf16.mxu1 %v1789_v34  ;;  %972 = vperm.xlu1 %1744, %v2077_v9   ;;  %v1838_v23 = vld [vmem:[%s1986_s6 + $0x1c8] ss:$12 sps:$4 sm:$0xff]   ;;  %v1843_v24 = vld [vmem:[%s1986_s6 + $0x1e4] ss:$12 sps:$4 sm:$0xff]   ;;  %v1841_v26 = vld [vmem:[%s1986_s6 + $0x1e0] ss:$12 sps:$4 sm:$0xff]  }
  0x2e   : > { %934 = vperm.xlu0 %1743, %v2077_v9   ;;  %v1846_v27 = vld [vmem:[%s1986_s6 + $0x1fc] ss:$12 sps:$4 sm:$0xff]   ;;  %v1844_v29 = vld [vmem:[%s1986_s6 + $0x1f8] ss:$12 sps:$4 sm:$0xff]   ;;  %v1849_v30 = vld [vmem:[%s1986_s6 + $0x214] ss:$12 sps:$4 sm:$0xff]  }
  0x2f   : > { %770 = vmatpush1.bf16.msra.mxu0 %v1790_v35  ;;  %v1926_v31 = vmov 6   ;;  %v1847_v32 = vld [vmem:[%s1986_s6 + $0x210] ss:$12 sps:$4 sm:$0xff]   ;;  %v1852_v33 = vld [vmem:[%s1986_s6 + $0x22c] ss:$12 sps:$4 sm:$0xff]   ;;  %v1927_v35 = vmov 7  }
  0x30   : > { %1672 = vmatpush3.bf16.msra.mxu1 %v1791_v36  ;;  %771 = vmatprep.subr.bf16.mxu0 %v1792_v37  ;;  %v1850_v34 = vld [vmem:[%s1986_s6 + $0x228] ss:$12 sps:$4 sm:$0xff]   ;;  %s1368_s29 = sand.u32 3, %s1651_s27   ;;  %p1365_p5 = scmp.lt.s32.totalorder %s1967_s19, 0 }
  0x31   : > { %1673 = vmatprep.subr.bf16.mxu1 %v1794_v38  ;;  %1746 = vset.pattern.permute.xlu1 %v1922_v17  ;;  %s1369_s30 = ssub.s32 0, %s1368_s29  ;;  %p1341_p6 = scmp.ne.s32.totalorder %s1967_s19, 16 }
  0x32   : > { %1016 = vperm.xlu1 %1746, %v2077_v9   ;;  %1745 = vset.pattern.permute.xlu0 %v1922_v17  ;;  %s2468_s30 = smov (!%p1365_p5, %s1369_s30), %s1368_s29 }
  0x33   : > { %772 = vmatpush1.bf16.msra.mxu0 %v1795_v39  ;;  %1012 = vperm.xlu0 %1745, %v2068_v6   ;;  %p1653_p7 = scmp.lt.s32.totalorder %s2468_s30, 0  ;;  %s1375_s6 = sadd.s32 4, %s2468_s30 }
  0x34   : > { %1674 = vmatpush3.bf16.msra.mxu1 %v1796_v40  ;;  %773 = vmatprep.subr.bf16.mxu0 %v1797_v42 }
  0x35   : > { %1690 = vmatprep.subr.bf16.mxu1 %v1920_v51  ;;  %s2470_s6 = smov (!%p1653_p7, %s1375_s6), %s2468_s30 }
  0x36   : > { %1747 = vset.pattern.permute.xlu1 %v1923_v22  ;;  %p1377_p8 = scmp.ne.s32.totalorder %s2470_s6, 0 }
  0x37   : > { %774 = vmatpush1.bf16.msra.mxu0 %v1799_v47  ;;  %876 = vmatmul.mubr.bf16.vlgmr.msra.gmra.mrb[0].mxu1 %v2042_v48 }
  0x38   : > { %1691 = vmatpush3.bf16.msra.mxu1 %v1800_v49  ;;  %775 = vmatprep.subr.bf16.mxu0 %v1801_v50  ;;  %v2123_v49 = vsub.s32 1, %v938_v46  ;;  %s1378_s8 = scalar_select %p1377_p8, 1, 0 }
  0x39   : > { %1692 = vmatprep.subr.bf16.mxu1 %v1920_v51  ;;  %1706 = vmatprep.mubr.msk.bf16.mxu1 %vm1921_vm0, %v1920_v51 }
  0x3a   : > { %1056 = vperm.xlu1 %1747, %v2068_v6   ;;  %1748 = vset.pattern.permute.xlu0 %v1923_v22  ;;  %v2167_v22 = vsub.s32 6, %v938_v46  ;;  %s1379_s9 = scvt.s32.f32 %s1378_s8 }
  0x3b   : > { %776 = vmatpush1.bf16.msra.mxu0 %v1803_v52  ;;  %1060 = vperm.xlu0 %1748, %v2077_v9  }
  0x3c   : > { %1693 = vmatpush3.bf16.msra.mxu1 %v1804_v53  ;;  %777 = vmatprep.subr.bf16.mxu0 %v1805_v54  ;;  %v2127_v53 = vsub.s32 2, %v938_v46 }
  0x3d   : > { %1694 = vmatprep.subr.bf16.mxu1 %v1920_v51 }
  0x3e   : > { %1749 = vset.pattern.permute.xlu1 %v1924_v25 }
  0x3f   : > { %778 = vmatpush1.bf16.msra.mxu0 %v1807_v55  ;;  %1100 = vperm.xlu1 %1749, %v2068_v6  }
  0x40   : > { %1695 = vmatpush3.bf16.msra.mxu1 %v1808_v56  ;;  %779 = vmatprep.subr.bf16.mxu0 %v1809_v57 }
  0x41   : > { %1696 = vmatprep.subr.bf16.mxu1 %v1920_v51  ;;  %1750 = vset.pattern.permute.xlu0 %v1925_v28 }
  0x42   : > { %1144 = vperm.xlu0 %1750, %v2068_v6  }
  0x43   : > { %780 = vmatpush1.bf16.msra.mxu0 %v1811_v58  ;;  %1104 = vperm.xlu1 %1749, %v2077_v9  }
  0x44   : > { %1697 = vmatpush3.bf16.msra.mxu1 %v1812_v59  ;;  %781 = vmatprep.subr.bf16.mxu0 %v1813_v60  ;;  %v2135_v60 = vsub.s32 3, %v938_v46 }
  0x45   : > { %1698 = vmatprep.subr.bf16.mxu1 %v1920_v51 }
  0x46   : > { %1753 = vset.pattern.permute.xlu0 %v1926_v31 }
  0x47   : > { %782 = vmatpush1.bf16.msra.mxu0 %v1815_v61  ;;  %1192 = vperm.xlu0 %1753, %v2077_v9  }
  0x48   : > { %1699 = vmatpush3.bf16.msra.mxu1 %v1816_v62  ;;  %783 = vmatprep.subr.bf16.mxu0 %v1817_v63 }
  0x49   : > { %1700 = vmatprep.subr.bf16.mxu1 %v1920_v51  ;;  %1751 = vset.pattern.permute.xlu1 %v1925_v28 }
  0x4a   : > { %1148 = vperm.xlu1 %1751, %v2077_v9  }
  0x4b   : > { %784 = vmatpush1.bf16.msra.mxu0 %v1819_v0  ;;  %1756 = vset.pattern.permute.xlu0 %v1919_v15 }
  0x4c   : > { %1701 = vmatpush3.bf16.msra.mxu1 %v1820_v1  ;;  %785 = vmatprep.subr.bf16.mxu0 %v1821_v2 }
  0x4d   : > { %1702 = vmatprep.subr.bf16.mxu1 %v1920_v51 }
  0x4e   : > { %1752 = vset.pattern.permute.xlu1 %v1926_v31 }
  0x4f   : > { %786 = vmatpush1.bf16.msra.mxu0 %v1823_v3  ;;  %1188 = vperm.xlu1 %1752, %v2068_v6  }
  0x50   : > { %1703 = vmatpush3.bf16.msra.mxu1 %v1824_v4  ;;  %787 = vmatprep.subr.bf16.mxu0 %v1825_v5 }
  0x51   : > { %1704 = vmatprep.subr.bf16.mxu1 %v1920_v51 }
  0x53   : > { %788 = vmatpush1.bf16.msra.mxu0 %v1827_v7  ;;  %1754 = vset.pattern.permute.xlu1 %v1927_v35  ;;  %v2150_v7 = vsub.s32 4, %v938_v46 }
  0x54   : > { %1705 = vmatpush3.bf16.msra.mxu1 %v1828_v8  ;;  %800 = vmatprep.subr.bf16.mxu0 %v1831_v10 }
  0x55   : > { %1232 = vperm.xlu1 %1754, %v2068_v6  }
  0x56   : > { %790 = vmatmul.mubr.bf16.vlgmr.msra.gmra.mrb[0].mxu0 %v2042_v48  ;;  %v2121_v48 = vsub.s32 0, %v938_v46 }
  0x57   : > { %1707 = vmatmul.mubr.bf16.vlgmr.msra.gmra.mrb[4].mxu1 %v372_v14  ;;  %801 = vmatpush1.bf16.msra.mxu0 %v1829_v13 }
  0x58   : > { %802 = vmatprep.subr.bf16.mxu0 %v1834_v16  ;;  %832 = vmatprep.mubr.bf16.mxu0 %v1919_v15 }
  0x59   : > { %1236 = vperm.xlu1 %1754, %v2077_v9  }
  0x5b   : > { %803 = vmatpush1.bf16.msra.mxu0 %v1832_v18 }
  0x5c   : > { %804 = vmatprep.subr.bf16.mxu0 %v1837_v19 }
  0x5d   : > { %1755 = vset.pattern.permute.xlu1 %v1919_v15 }
  0x5f   : > { %805 = vmatpush1.bf16.msra.mxu0 %v1835_v20 }
  0x60   : > { %806 = vmatprep.subr.bf16.mxu0 %v1840_v21 }
  0x63   : > { %807 = vmatpush1.bf16.msra.mxu0 %v1838_v23 }
  0x64   : > { %808 = vmatprep.subr.bf16.mxu0 %v1843_v24 }
  0x67   : > { %809 = vmatpush1.bf16.msra.mxu0 %v1841_v26 }
  0x68   : > { %810 = vmatprep.subr.bf16.mxu0 %v1846_v27 }
  0x6b   : > { %811 = vmatpush1.bf16.msra.mxu0 %v1844_v29  ;;  %v2175_v29 = vsub.s32 7, %v938_v46 }
  0x6c   : > { %812 = vmatprep.subr.bf16.mxu0 %v1849_v30 }
  0x6f   : > { %813 = vmatpush1.bf16.msra.mxu0 %v1847_v32 }
  0x70   : > { %814 = vmatprep.subr.bf16.mxu0 %v1852_v33 }
  0x73   : > { %815 = vmatpush1.bf16.msra.mxu0 %v1850_v34 }
  0x76   : > { %833 = vmatmul.mubr.bf16.vlgmr.msra.gmra.mrb[0].mxu0 %v372_v14  ;;  %v2159_v14 = vsub.s32 5, %v938_v46 }
  0xa8   : > { %v2113_v42 = vpop.permute.xlu1 %968 }
  0xa9   : > { %v2119_v47 = vpop.permute.xlu0 %929 }
  0xac   : > { %v2115_v43 = vpop.permute.xlu1 %972 }
  0xad   : > { %v2129_v54 = vpop.permute.xlu0 %934 }
  0xb1   : > { %v2117_v45 = vpop.permute.xlu1 %1016 }
  0xb2   : > { %v2142_v1 = vpop.permute.xlu0 %1012 }
  0xb9   : > { %v2125_v15 = vpop.permute.xlu1 %1056 }
  0xba   : > { %v2162_v17 = vpop.permute.xlu0 %1060 }
  0xbe   : > { %v2140_v0 = vpop.permute.xlu1 %1100 }
  0xc1   : > { %v2173_v27 = vpop.permute.xlu0 %1144 }
  0xc2   : > { %v2152_v8 = vpop.permute.xlu1 %1104 }
  0xc9   : > { %v2164_v19 = vpop.permute.xlu1 %1148 }
  0xce   : > { %v2179_v32 = vpop.permute.xlu1 %1188 }
  0xd4   : > { %v2191_v46 = vpop.permute.xlu1 %1232 }
 0x10a   : > { %v1675_v36 = vpop.f32.mrb[0].mxu1 }
 0x10b   : > { %v1676_v37 = vpop.f32.mrb[1].mxu1 }
 0x10c   : > { %v1677_v38 = vadd.f32 %v1676_v37, %v1675_v36  ;;  %v1678_v39 = vpop.f32.mrb[2].mxu1 }
 0x10d   : > { %v1679_v40 = vpop.f32.mrb[3].mxu1 }
 0x10e   : > { %v1680_v41 = vadd.f32 %v1679_v40, %v1678_v39 }
 0x12a   : > { %v918_v50 = vpop.f32.mrb[4].mxu1 }
 0x12b   : > { %v919_v51 = vadd.f32 %v1677_v38, %v918_v50  ;;  %v1708_v52 = vpop.f32.mrb[5].mxu1  ;;  %v2193_v50 = vpop.permute.xlu0 %1192 }
 0x12c   : > { %v921_v55 = vpop.f32.mrb[6].mxu1 }
 0x12d   : > { %v2131_v56 = vadd.f32 %v1680_v41, %v921_v55  ;;  %v948_v57 = vrot.slane %v919_v51, %v2121_v48  ;;  %v986_v58 = vrot.slane %v919_v51, %v2123_v49  ;;  %v1709_v59 = vpop.f32.mrb[7].mxu1  ;;  %v1030_v63 = vrot.slane %v919_v51, %v2127_v53 }
 0x12e   : > { %v1074_v4 = vrot.slane %v919_v51, %v2135_v60  ;;  %v1118_v16 = vrot.slane %v919_v51, %v2150_v7  ;;  %v1162_v24 = vrot.slane %v919_v51, %v2159_v14  ;;  %v1206_v31 = vrot.slane %v919_v51, %v2167_v22 }
 0x12f   : > { %v963_v61 = vmul.f32 %v948_v57, %v2119_v47  ;;  %v1001_v62 = vmul.f32 %v986_v58, %v2113_v42  ;;  %v1045_v3 = vmul.f32 %v1030_v63, %v2142_v1  ;;  %v960_v5 = vrot.slane %v2131_v56, %v2121_v48 }
 0x130   : > { %v998_v6 = vrot.slane %v2131_v56, %v2123_v49  ;;  %v1089_v10 = vmul.f32 %v1074_v4, %v2125_v15  ;;  %v1042_v13 = vrot.slane %v2131_v56, %v2127_v53  ;;  %v1133_v23 = vmul.f32 %v1118_v16, %v2140_v0 }
 0x131   : > { %v1007_v2 = vadd.f32 %v1001_v62, %v963_v61  ;;  %v966_v11 = vmul.f32 %v960_v5, %v2129_v54  ;;  %v1086_v25 = vrot.slane %v2131_v56, %v2135_v60  ;;  %v1177_v30 = vmul.f32 %v1162_v24, %v2173_v27 }
 0x132   : > { %v1004_v12 = vmul.f32 %v998_v6, %v2115_v43  ;;  %v1048_v21 = vmul.f32 %v1042_v13, %v2117_v45  ;;  %v1130_v34 = vrot.slane %v2131_v56, %v2150_v7  ;;  %v1250_v37 = vrot.slane %v919_v51, %v2175_v29 }
 0x133   : > { %v1051_v9 = vadd.f32 %v1045_v3, %v1007_v2  ;;  %v1092_v33 = vmul.f32 %v1086_v25, %v2162_v17  ;;  %v1221_v38 = vmul.f32 %v1206_v31, %v2179_v32  ;;  %v1174_v40 = vrot.slane %v2131_v56, %v2159_v14 }
 0x134   : > { %v1010_v20 = vadd.f32 %v1004_v12, %v966_v11  ;;  %v1136_v39 = vmul.f32 %v1130_v34, %v2152_v8  ;;  %v1218_v44 = vrot.slane %v2131_v56, %v2167_v22  ;;  %v1265_v55 = vmul.f32 %v1250_v37, %v2191_v46 }
 0x135   : > { %v1095_v18 = vadd.f32 %v1089_v10, %v1051_v9  ;;  %v1262_v51 = vrot.slane %v2131_v56, %v2175_v29  ;;  %v1180_v58 = vmul.f32 %v1174_v40, %v2164_v19 }
 0x136   : > { %v1054_v28 = vadd.f32 %v1048_v21, %v1010_v20  ;;  %v2210_v2 = vmul.f32 %v1218_v44, %v2193_v50 }
 0x137   : > { %v1139_v26 = vadd.f32 %v1133_v23, %v1095_v18 }
 0x138   : > { %v1098_v36 = vadd.f32 %v1092_v33, %v1054_v28 }
 0x139   : > { %v1183_v35 = vadd.f32 %v1177_v30, %v1139_v26 }
 0x13a   : > { %v1142_v52 = vadd.f32 %v1136_v39, %v1098_v36 }
 0x13b   : > { %v1227_v41 = vadd.f32 %v1221_v38, %v1183_v35 }
 0x13c   : > { %v2220_v9 = vadd.f32 %v1180_v58, %v1142_v52 }
 0x13d   : > { %v2218_v6 = vadd.f32 %v1265_v55, %v1227_v41 }
 0x149   : > { %v2198_v57 = vpop.f32.mrb[0].mxu0 }
 0x14a   : > { %v940_v59 = vrot.slane %v2198_v57, %v2121_v48  ;;  %v978_v61 = vrot.slane %v2198_v57, %v2123_v49  ;;  %v1022_v62 = vrot.slane %v2198_v57, %v2127_v53  ;;  %v2207_v63 = vpop.f32.mrb[1].mxu0  ;;  %v1066_v10 = vrot.slane %v2198_v57, %v2135_v60 }
 0x14b   : > { %v944_v3 = vrot.slane %v2207_v63, %v2121_v48  ;;  %v982_v4 = vrot.slane %v2207_v63, %v2123_v49  ;;  %v2216_v5 = vpop.f32.mrb[2].mxu0  ;;  %v1110_v11 = vrot.slane %v2198_v57, %v2150_v7  ;;  %v1026_v12 = vrot.slane %v2207_v63, %v2127_v53 }
 0x14c   : > { %v2228_v13 = vpop.f32.mrb[3].mxu0  ;;  %v961_v16 = vmul.f32 %v940_v59, %v2119_v47  ;;  %v999_v18 = vmul.f32 %v978_v61, %v2113_v42  ;;  %v1043_v20 = vmul.f32 %v1022_v62, %v2142_v1  ;;  %v1070_v21 = vrot.slane %v2207_v63, %v2135_v60 }
 0x14d   : > { %v962_v23 = vmul.f32 %v944_v3, %v2119_v47  ;;  %v952_v24 = vrot.slane %v2216_v5, %v2121_v48  ;;  %v990_v25 = vrot.slane %v2216_v5, %v2123_v49  ;;  %v1034_v26 = vrot.slane %v2216_v5, %v2127_v53 }
 0x14e   : > { %v1000_v28 = vmul.f32 %v982_v4, %v2113_v42  ;;  %v956_v30 = vrot.slane %v2228_v13, %v2121_v48  ;;  %v994_v31 = vrot.slane %v2228_v13, %v2123_v49  ;;  %v1038_v47 = vrot.slane %v2228_v13, %v2127_v53 }
 0x14f   : > { %v1044_v33 = vmul.f32 %v1026_v12, %v2142_v1  ;;  %v1114_v34 = vrot.slane %v2207_v63, %v2150_v7  ;;  %v1078_v35 = vrot.slane %v2216_v5, %v2135_v60  ;;  %v1082_v42 = vrot.slane %v2228_v13, %v2135_v60 }
 0x150   : > { %v964_v36 = vmul.f32 %v952_v24, %v2129_v54  ;;  %v1122_v48 = vrot.slane %v2216_v5, %v2150_v7  ;;  %v965_v49 = vmul.f32 %v956_v30, %v2129_v54  ;;  %v1003_v53 = vmul.f32 %v994_v31, %v2115_v43 }
 0x151   : > { %v1002_v1 = vmul.f32 %v990_v25, %v2115_v43  ;;  %v1046_v37 = vmul.f32 %v1034_v26, %v2117_v45  ;;  %v1047_v38 = vmul.f32 %v1038_v47, %v2117_v45  ;;  %v1005_v39 = vadd.f32 %v999_v18, %v961_v16 }
 0x152   : > { %v1009_v40 = vadd.f32 %v1003_v53, %v965_v49  ;;  %v1091_v41 = vmul.f32 %v1082_v42, %v2162_v17  ;;  %v1126_v60 = vrot.slane %v2228_v13, %v2150_v7  ;;  %v1006_v44 = vadd.f32 %v1000_v28, %v962_v23 }
 0x153   : > { %v1049_v52 = vadd.f32 %v1043_v20, %v1005_v39  ;;  %v1087_v55 = vmul.f32 %v1066_v10, %v2125_v15  ;;  %v1088_v54 = vmul.f32 %v1070_v21, %v2125_v15  ;;  %v1131_v58 = vmul.f32 %v1110_v11, %v2140_v0 }
 0x154   : > { %v1053_v43 = vadd.f32 %v1047_v38, %v1009_v40  ;;  %v1050_v59 = vadd.f32 %v1044_v33, %v1006_v44  ;;  %v1154_v45 = vrot.slane %v2198_v57, %v2159_v14  ;;  %v1158_v61 = vrot.slane %v2207_v63, %v2159_v14 }
 0x155   : > { %v1093_v62 = vadd.f32 %v1087_v55, %v1049_v52  ;;  %v1198_v7 = vrot.slane %v2198_v57, %v2167_v22  ;;  %v1202_v3 = vrot.slane %v2207_v63, %v2167_v22  ;;  %v1242_v15 = vrot.slane %v2198_v57, %v2175_v29 }
 0x156   : > { %v1170_v4 = vrot.slane %v2228_v13, %v2159_v14  ;;  %v1214_v10 = vrot.slane %v2228_v13, %v2167_v22  ;;  %v1094_v11 = vadd.f32 %v1088_v54, %v1050_v59  ;;  %v1132_v12 = vmul.f32 %v1114_v34, %v2140_v0 }
 0x157   : > { %v1135_v16 = vmul.f32 %v1126_v60, %v2152_v8  ;;  %v1137_v18 = vadd.f32 %v1131_v58, %v1093_v62  ;;  %v1175_v20 = vmul.f32 %v1154_v45, %v2173_v27  ;;  %v1246_v21 = vrot.slane %v2207_v63, %v2175_v29 }
 0x158   : > { %v1138_v23 = vadd.f32 %v1132_v12, %v1094_v11  ;;  %v1176_v57 = vmul.f32 %v1158_v61, %v2173_v27  ;;  %v1219_v24 = vmul.f32 %v1198_v7, %v2179_v32  ;;  %v1008_v25 = vadd.f32 %v1002_v1, %v964_v36 }
 0x159   : > { %v1181_v26 = vadd.f32 %v1175_v20, %v1137_v18  ;;  %v1220_v28 = vmul.f32 %v1202_v3, %v2179_v32  ;;  %v1263_v30 = vmul.f32 %v1242_v15, %v2191_v46  ;;  %v1097_v0 = vadd.f32 %v1091_v41, %v1053_v43  ;;  %v1317_v15 = vld [vmem:[%s1976_s25] sm:$0xff]  ;;  %s2347_s25 = scalar_select %p1341_p6, 1, 0 }
 0x15a   : > { %v1182_v31 = vadd.f32 %v1176_v57, %v1138_v23  ;;  %v1052_v47 = vadd.f32 %v1046_v37, %v1008_v25  ;;  %v1090_v33 = vmul.f32 %v1078_v35, %v2162_v17  ;;  %v1166_v34 = vrot.slane %v2216_v5, %v2159_v14  ;;  %v1237_v35 = vpop.permute.xlu1 %1236 }
 0x15b   : > { %v1225_v63 = vadd.f32 %v1219_v24, %v1181_v26  ;;  %v1264_v42 = vmul.f32 %v1246_v21, %v2191_v46  ;;  %v1141_v27 = vadd.f32 %v1135_v16, %v1097_v0  ;;  %v1179_v49 = vmul.f32 %v1170_v4, %v2164_v19  ;;  %v1329_v4 = vld [vmem:[%s1981_s28] sm:$0xff]  ;;  %s1343_s28 = scvt.s32.f32 %s2347_s25 }
 0x15c   : > { %v1226_v36 = vadd.f32 %v1220_v28, %v1182_v31  ;;  %v1096_v53 = vadd.f32 %v1090_v33, %v1052_v47  ;;  %v1134_v32 = vmul.f32 %v1122_v48, %v2152_v8  ;;  %v1210_v1 = vrot.slane %v2216_v5, %v2167_v22 }
 0x15d   : > { %v2301_v38 = vadd.f32 %v1263_v30, %v1225_v63  ;;  %v1185_v37 = vadd.f32 %v1179_v49, %v1141_v27  ;;  %v1223_v17 = vmul.f32 %v1214_v10, %v2193_v50  ;;  %v1258_v14 = vrot.slane %v2228_v13, %v2175_v29  ;;  %s1351_s7 = ssub.f32 1.0, %s1343_s28 }
 0x15e   : > { %v2306_v46 = vadd.f32 %v1264_v42, %v1226_v36  ;;  %v1140_v39 = vadd.f32 %v1134_v32, %v1096_v53  ;;  %v1178_v40 = vmul.f32 %v1166_v34, %v2164_v19  ;;  %v1254_v8 = vrot.slane %v2216_v5, %v2175_v29 }
 0x15f   : > { %v1230_v22 = vadd.f32 %v2210_v2, %v2220_v9  ;;  %v1229_v48 = vadd.f32 %v1223_v17, %v1185_v37  ;;  %v1267_v41 = vmul.f32 %v1258_v14, %v1237_v35  ;;  %v1284_v60 = vmul.f32 %v2301_v38, %v2301_v38 }
 0x160   : > { %v1275_v13 = vadd.f32 %v2306_v46, %v2301_v38  ;;  %v1184_v44 = vadd.f32 %v1178_v40, %v1140_v39  ;;  %v1222_v52 = vmul.f32 %v1210_v1, %v2193_v50  ;;  %v1285_v19 = vmul.f32 %v2306_v46, %v2306_v46 }
 0x161   : > { %v1268_v5 = vmul.f32 %v1262_v51, %v1237_v35  ;;  %v2323_v55 = vadd.f32 %v1267_v41, %v1229_v48  ;;  %v1266_v54 = vmul.f32 %v1254_v8, %v1237_v35  ;;  %v1286_v59 = vmul.f32 %v2218_v6, %v2218_v6  ;;  %v1381_v35 = vld [vmem:[#allocation2 + $0x8] sm:$0xff] }
 0x162   : > { %v1276_v2 = vadd.f32 %v1275_v13, %v2218_v6  ;;  %v1228_v9 = vadd.f32 %v1222_v52, %v1184_v44  ;;  %v1290_v58 = vadd.f32 %v1285_v19, %v1284_v60  ;;  %v1352_v26 = vstv %s1351_s7  ;;  %v1382_v13 = vld [vmem:[#allocation2 + $0x10] sm:$0xff]  ;;  %v1383_v44 = vld [vmem:[#allocation2 + $0x18] sm:$0xff] }
 0x163   : > { %v2326_v43 = vadd.f32 %v1268_v5, %v1230_v22  ;;  %v1288_v56 = vmul.f32 %v2323_v55, %v2323_v55  ;;  %v1353_v28 = vmul.f32 %v1352_v26, %v2301_v38  ;;  %v1354_v30 = vmul.f32 %v1352_v26, %v2306_v46 }
 0x164   : > { %1277 = vadd.xlane.f32.xlu0 %v1276_v2  ;;  %v2328_v50 = vadd.f32 %v1266_v54, %v1228_v9  ;;  %v1291_v51 = vadd.f32 %v1290_v58, %v1286_v59  ;;  %v1355_v0 = vmul.f32 %v1352_v26, %v2218_v6  ;;  %v1357_v53 = vmul.f32 %v1352_v26, %v2323_v55  ;;  %v1384_v2 = vld [vmem:[#allocation2 + $0x20] sm:$0xff]  ;;  %v1385_v9 = vld [vmem:[#allocation2 + $0x28] sm:$0xff] }
 0x165   : > { %v1289_v62 = vmul.f32 %v2326_v43, %v2326_v43  ;;  %v1358_v31 = vmul.f32 %v1352_v26, %v2326_v43  ;;  %v1386_v32 = vstv %s1379_s9 }
 0x166   : > { %v1279_v29 = vadd.f32 %v2323_v55, %v2328_v50  ;;  %v1287_v45 = vmul.f32 %v2328_v50, %v2328_v50  ;;  %v1356_v40 = vmul.f32 %v1352_v26, %v2328_v50 }
 0x168   : > { %v1280_v61 = vadd.f32 %v1279_v29, %v2326_v43  ;;  %1292 = vadd.xlane.f32.xlu0 %v1291_v51  ;;  %v1294_v7 = vadd.f32 %v1288_v56, %v1287_v45  ;;  %v1389_v56 = vmul.f32 %v1386_v32, %v1382_v13  ;;  %v1390_v29 = vmul.f32 %v1386_v32, %v1383_v44 }
 0x16a   : > { %1281 = vadd.xlane.f32.xlu1 %v1280_v61  ;;  %v1295_v3 = vadd.f32 %v1294_v7, %v1289_v62 }
 0x16c   : > { %1296 = vadd.xlane.f32.xlu0 %v1295_v3  ;;  %v1391_v3 = vmul.f32 %v1386_v32, %v1384_v2 }
 0x17b   : > { %1320 = vperm.xlu1 %1755, %v1317_v15   ;;  %v1392_v15 = vmul.f32 %v1386_v32, %v1385_v9 }
 0x182   : > { %1332 = vperm.xlu0 %1756, %v1329_v4  }
 0x1f1   : > { %v1278_v10 = vpop.xlane.xlu0 %1277 }
 0x1f5   : > { %v1293_v11 = vpop.xlane.xlu0 %1292 }
 0x1f7   : > { %v1282_v12 = vpop.xlane.xlu1 %1281 }
 0x1f8   : > { %v1283_v16 = vadd.f32 %v1282_v12, %v1278_v10 }
 0x1f9   : > { %v1297_v18 = vpop.xlane.xlu0 %1296 }
 0x1fa   : > { %v1299_v20 = vmul.f32 0.0013020834, %v1283_v16  ;;  %v1298_v21 = vadd.f32 %v1297_v18, %v1293_v11 }
 0x1fb   : > { %v1321_v36 = vpop.permute.xlu1 %1320 }
 0x1fc   : > { %v1300_v23 = vmul.f32 0.0013020834, %v1298_v21  ;;  %v1301_v57 = vmul.f32 %v1299_v20, %v1299_v20  ;;  %v1303_v47 = vsub.f32 %v2301_v38, %v1299_v20  ;;  %v1304_v33 = vsub.f32 %v2306_v46, %v1299_v20  ;;  %v1380_v38 = vld [vmem:[#allocation2] sm:$0xff] }
 0x1fd   : > { %v1305_v34 = vsub.f32 %v2218_v6, %v1299_v20  ;;  %v1306_v63 = vsub.f32 %v2328_v50, %v1299_v20  ;;  %v1307_v27 = vsub.f32 %v2323_v55, %v1299_v20  ;;  %v1308_v49 = vsub.f32 %v2326_v43, %v1299_v20 }
 0x1fe   : > { %v1302_v24 = vsub.f32 %v1300_v23, %v1301_v57  ;;  %v1344_v6 = vstv %s1343_s28  ;;  %v1387_v5 = vmul.f32 %v1386_v32, %v1380_v38  ;;  %v1388_v55 = vmul.f32 %v1386_v32, %v1381_v35 }
 0x200   : > { %v1309_v25 = vadd.f32 1e-05, %v1302_v24 }
 0x201   : > { %v1333_v8 = vpop.permute.xlu0 %1332 }
 0x202   : > { %1853 = vrsqrt.f32 %v1309_v25 }
 0x20c   : > { %v1854_v42 = vpop.eup %1853 }
 0x20d   : > { %v1311_v1 = vmul.f32 %v1854_v42, %v1303_v47  ;;  %v1312_v37 = vmul.f32 %v1854_v42, %v1304_v33  ;;  %v1313_v17 = vmul.f32 %v1854_v42, %v1305_v34  ;;  %v1314_v14 = vmul.f32 %v1854_v42, %v1306_v63 }
 0x20e   : > { %v1315_v46 = vmul.f32 %v1854_v42, %v1307_v27  ;;  %v1316_v39 = vmul.f32 %v1854_v42, %v1308_v49 }
 0x20f   : > { %v1323_v22 = vmul.f32 %v1321_v36, %v1311_v1  ;;  %v1324_v48 = vmul.f32 %v1321_v36, %v1312_v37  ;;  %v1325_v41 = vmul.f32 %v1321_v36, %v1313_v17  ;;  %v1326_v60 = vmul.f32 %v1321_v36, %v1314_v14 }
 0x210   : > { %v1327_v52 = vmul.f32 %v1321_v36, %v1315_v46  ;;  %v1328_v19 = vmul.f32 %v1321_v36, %v1316_v39 }
 0x211   : > { %v1335_v54 = vadd.f32 %v1333_v8, %v1323_v22  ;;  %v1336_v58 = vadd.f32 %v1333_v8, %v1324_v48  ;;  %v1337_v43 = vadd.f32 %v1333_v8, %v1325_v41  ;;  %v1338_v59 = vadd.f32 %v1333_v8, %v1326_v60 }
 0x212   : > { %v1339_v50 = vadd.f32 %v1333_v8, %v1327_v52  ;;  %v1340_v51 = vadd.f32 %v1333_v8, %v1328_v19 }
 0x213   : > { %v1345_v45 = vmul.f32 %v1344_v6, %v1335_v54  ;;  %v1346_v61 = vmul.f32 %v1344_v6, %v1336_v58  ;;  %v1347_v62 = vmul.f32 %v1344_v6, %v1337_v43  ;;  %v1348_v7 = vmul.f32 %v1344_v6, %v1338_v59 }
 0x214   : > { %v1349_v4 = vmul.f32 %v1344_v6, %v1339_v50  ;;  %v1350_v10 = vmul.f32 %v1344_v6, %v1340_v51 }
 0x215   : > { %v1359_v11 = vadd.f32 %v1353_v28, %v1345_v45  ;;  %v1360_v12 = vadd.f32 %v1354_v30, %v1346_v61  ;;  %v1361_v16 = vadd.f32 %v1355_v0, %v1347_v62  ;;  %v1362_v18 = vadd.f32 %v1356_v40, %v1348_v7 }
 0x216   : > { %v1363_v20 = vadd.f32 %v1357_v53, %v1349_v4  ;;  %v1364_v21 = vadd.f32 %v1358_v31, %v1350_v10 }
 0x217   : > { %v2367_v23 = vadd.f32 %v1387_v5, %v1359_v11  ;;  %v2369_v57 = vadd.f32 %v1388_v55, %v1360_v12  ;;  %v2371_v24 = vadd.f32 %v1389_v56, %v1361_v16  ;;  %v2373_v25 = vadd.f32 %v1390_v29, %v1362_v18 }
 0x218   : > { %v2375_v26 = vadd.f32 %v1391_v3, %v1363_v20  ;;  %v2377_v47 = vadd.f32 %v1392_v15, %v1364_v21 }
 0x219   : > { %v1405_v33 = vmin.f32 %v2367_v23, 20.0  ;;  %v1406_v28 = vmin.f32 %v2369_v57, 20.0  ;;  %v1407_v30 = vmin.f32 %v2371_v24, 20.0  ;;  %v1408_v0 = vmin.f32 %v2373_v25, 20.0 }
 0x21a   : > { %v1409_v31 = vmin.f32 %v2375_v26, 20.0  ;;  %v1410_v34 = vmin.f32 %v2377_v47, 20.0  ;;  %vm1399_vm1 = vcmp.gt.f32.partialorder %v2367_v23, 20.0  ;;  %vm1400_vm2 = vcmp.gt.f32.partialorder %v2369_v57, 20.0 }
 0x21b   : > { %v1411_v63 = vmul.f32 1.442695, %v1405_v33  ;;  %v1413_v42 = vmul.f32 1.442695, %v1406_v28  ;;  %v1415_v27 = vmul.f32 1.442695, %v1407_v30 }
 0x21c   : > { %v1417_v49 = vmul.f32 1.442695, %v1408_v0  ;;  %v1419_v36 = vmul.f32 1.442695, %v1409_v31  ;;  %v1421_v53 = vmul.f32 1.442695, %v1410_v34 }
 0x21d   : > { %1855 = vpow2.f32 %v1411_v63  ;;  %vm1401_vm3 = vcmp.gt.f32.partialorder %v2371_v24, 20.0  ;;  %vm1402_vm8 = vcmp.gt.f32.partialorder %v2373_v25, 20.0  ;;  %vm1403_vm10 = vcmp.gt.f32.partialorder %v2375_v26, 20.0 }
 0x21e   : > { %1857 = vpow2.f32 %v1413_v42  ;;  %vm1404_vm12 = vcmp.gt.f32.partialorder %v2377_v47, 20.0 }
 0x21f   : > { %1859 = vpow2.f32 %v1415_v27 }
 0x220   : > { %1861 = vpow2.f32 %v1417_v49 }
 0x221   : > { %1863 = vpow2.f32 %v1419_v36 }
 0x222   : > { %1865 = vpow2.f32 %v1421_v53 }
 0x227   : > { %v1856_v32 = vpop.eup %1855 }
 0x228   : > { %v1858_v1 = vpop.eup %1857  ;;  %v1423_v37 = vadd.f32 1.0, %v1856_v32  ;;  %v1426_v40 = vmul.f32 -0.5, %v1856_v32  ;;  %v1429_v41 = vand.u32 2147483647, %v1856_v32 }
 0x229   : > { %v1860_v17 = vpop.eup %1859  ;;  %v1432_v14 = vadd.f32 1.0, %v1858_v1  ;;  %v1435_v8 = vmul.f32 -0.5, %v1858_v1  ;;  %v1438_v52 = vand.u32 2147483647, %v1858_v1 }
 0x22a   : > { %v1862_v38 = vpop.eup %1861  ;;  %1867 = vlog2.f32 %v1423_v37  ;;  %v1441_v35 = vadd.f32 1.0, %v1860_v17  ;;  %v1444_v48 = vmul.f32 -0.5, %v1860_v17  ;;  %v1427_v44 = vadd.f32 1.0, %v1426_v40 }
 0x22b   : > { %v1864_v46 = vpop.eup %1863  ;;  %1869 = vlog2.f32 %v1432_v14  ;;  %v1450_v39 = vadd.f32 1.0, %v1862_v38  ;;  %v1453_v60 = vmul.f32 -0.5, %v1862_v38  ;;  %v1436_v19 = vadd.f32 1.0, %v1435_v8 }
 0x22c   : > { %1871 = vlog2.f32 %v1441_v35  ;;  %v2385_v6 = vpop.eup %1865  ;;  %v1459_v22 = vadd.f32 1.0, %v1864_v46  ;;  %v1447_v5 = vand.u32 2147483647, %v1860_v17  ;;  %v1445_v55 = vadd.f32 1.0, %v1444_v48 }
 0x22d   : > { %1873 = vlog2.f32 %v1450_v39  ;;  %v1468_v13 = vadd.f32 1.0, %v2385_v6  ;;  %v1462_v2 = vmul.f32 -0.5, %v1864_v46  ;;  %vm2391_vm4 = vcmp.lt.f32.partialorder %v1429_v41, 0.0004427343 }
 0x22e   : > { %1875 = vlog2.f32 %v1459_v22  ;;  %v1454_v58 = vadd.f32 1.0, %v1453_v60  ;;  %v1428_v56 = vmul.f32 %v1856_v32, %v1427_v44  ;;  %vm2395_vm5 = vcmp.lt.f32.partialorder %v1438_v52, 0.0004427343 }
 0x22f   : > { %1877 = vlog2.f32 %v1468_v13  ;;  %v1471_v50 = vmul.f32 -0.5, %v2385_v6  ;;  %v1437_v61 = vmul.f32 %v1858_v1, %v1436_v19  ;;  %vm2400_vm6 = vcmp.lt.f32.partialorder %v1447_v5, 0.0004427343 }
 0x230   : > { %v1456_v7 = vand.u32 2147483647, %v1862_v38  ;;  %v1446_v4 = vmul.f32 %v1860_v17, %v1445_v55  ;;  %v1463_v10 = vadd.f32 1.0, %v1462_v2  ;;  %v1455_v16 = vmul.f32 %v1862_v38, %v1454_v58 }
 0x231   : > { %v1465_v18 = vand.u32 2147483647, %v1864_v46  ;;  %v1472_v28 = vadd.f32 1.0, %v1471_v50  ;;  %v1474_v31 = vand.u32 2147483647, %v2385_v6 }
 0x232   : > { %vm1457_vm7 = vcmp.lt.f32.partialorder %v1456_v7, 0.0004427343  ;;  %v1464_v42 = vmul.f32 %v1864_v46, %v1463_v10 }
 0x233   : > { %vm1466_vm9 = vcmp.lt.f32.partialorder %v1465_v18, 0.0004427343  ;;  %v1473_v53 = vmul.f32 %v2385_v6, %v1472_v28  ;;  %vm1475_vm11 = vcmp.lt.f32.partialorder %v1474_v31, 0.0004427343 }
 0x234   : > { %v1868_v9 = vpop.eup %1867 }
 0x235   : > { %v1870_v43 = vpop.eup %1869  ;;  %v1425_v59 = vmul.f32 0.6931472, %v1868_v9 }
 0x236   : > { %v1872_v51 = vpop.eup %1871  ;;  %v1434_v45 = vmul.f32 0.6931472, %v1870_v43 }
 0x237   : > { %v1431_v3 = vsel %vm2391_vm4, %v1428_v56, %v1425_v59  ;;  %v1443_v15 = vmul.f32 0.6931472, %v1872_v51  ;;  %v1874_v11 = vpop.eup %1873 }
 0x238   : > { %v1440_v12 = vsel %vm2395_vm5, %v1437_v61, %v1434_v45  ;;  %v1477_v20 = vsel %vm1399_vm1, %v2367_v23, %v1431_v3  ;;  %v1452_v33 = vmul.f32 0.6931472, %v1874_v11  ;;  %v1876_v0 = vpop.eup %1875  ;;  %1492 = sbr.rel (%p1377_p8) target bundleno = 575 (0x23f), region = 48 }
 0x239   : > { %v1449_v21 = vsel %vm2400_vm6, %v1446_v4, %v1443_v15  ;;  %v1478_v30 = vsel %vm1400_vm2, %v2369_v57, %v1440_v12  ;;  %1483 = vst [vmem:[#allocation3] sm:$0xff] %v1477_v20  ;;  %v1461_v63 = vmul.f32 0.6931472, %v1876_v0  ;;  %v1878_v27 = vpop.eup %1877  ;;  %1493 = vst [vmem:[#allocation2] sm:$0xff] (!%p1377_p8), %v1477_v20 }
 0x23a   : > { %v1479_v34 = vsel %vm1401_vm3, %v2371_v24, %v1449_v21  ;;  %1484 = vst [vmem:[#allocation3 + $0x8] sm:$0xff] %v1478_v30  ;;  %v1458_v23 = vsel %vm1457_vm7, %v1455_v16, %v1452_v33  ;;  %v1470_v36 = vmul.f32 0.6931472, %v1878_v27  ;;  %1494 = vst [vmem:[#allocation2 + $0x8] sm:$0xff] (!%p1377_p8), %v1478_v30 }
 0x23b   : > { %1485 = vst [vmem:[#allocation3 + $0x10] sm:$0xff] %v1479_v34  ;;  %v1480_v57 = vsel %vm1402_vm8, %v2373_v25, %v1458_v23  ;;  %v1467_v49 = vsel %vm1466_vm9, %v1464_v42, %v1461_v63  ;;  %1495 = vst [vmem:[#allocation2 + $0x10] sm:$0xff] (!%p1377_p8), %v1479_v34 }
 0x23c   : > { %1486 = vst [vmem:[#allocation3 + $0x18] sm:$0xff] %v1480_v57  ;;  %v1481_v24 = vsel %vm1403_vm10, %v2375_v26, %v1467_v49  ;;  %v1476_v32 = vsel %vm1475_vm11, %v1473_v53, %v1470_v36  ;;  %1496 = vst [vmem:[#allocation2 + $0x18] sm:$0xff] (!%p1377_p8), %v1480_v57 }
 0x23d   : > { %1487 = vst [vmem:[#allocation3 + $0x20] sm:$0xff] %v1481_v24  ;;  %v1482_v1 = vsel %vm1404_vm12, %v2377_v47, %v1476_v32  ;;  %1497 = vst [vmem:[#allocation2 + $0x20] sm:$0xff] (!%p1377_p8), %v1481_v24 }
 0x23e   : > { %1488 = vst [vmem:[#allocation3 + $0x28] sm:$0xff] %v1482_v1  ;;  %1498 = vst [vmem:[#allocation2 + $0x28] sm:$0xff] (!%p1377_p8), %v1482_v1 }
 0x23f PF: > { %p1719_p9 = scmp.eq.s32.totalorder %s1967_s19, 16  ;;  %s1928_s10 = smov [#allocation3]  }
 0x240   : > { %s1505_s11 = sshll.u32 %s1928_s10, 4  ;;  %s1506_s11 = int_to_ptr.vmem [resolvable:$true] %s1505_s11 }
 0x241   : > { %s1879_s12 = scalar_lea.vmem %s1506_s11, 768  ;;  %p1886_p13 = scmp.lt.s32.totalorder %s1506_s11, %s1506_s11 }
 0x242   : > { %p1880_p10 = scmp.ne.s32.totalorder %s1506_s11, %s1879_s12  ;;  %p1887_p0 = scmp.lt.s32.totalorder %s1879_s12, %s1879_s12 }
 0x244   : > { %p1881_p11 = pnand %p1880_p10, %p1719_p9  ;;  %p1888_p1 = por %p1887_p0, %p1886_p13 }
 0x246   : > { %p1882_p12 = pneg %p1881_p11 }
 0x248   : > { %p1889_p2 = pnand %p1888_p1, %p1882_p12 }
 0x24a   : > { %1892 = shalt.err (!%p1889_p2)
}
 0x24b   : > { %s1893_s15 = scalar_lea.hbm %s2460_s5, 768 }
 0x24c   : > { %p1894_p3 = scmp.ne.s32.totalorder %s2460_s5, %s1893_s15  ;;  %p1899_p6 = scmp.lt.u32.totalorder %s1893_s15, %s2460_s5 }
 0x24e   : > { %p1895_p4 = pnand %p1894_p3, %p1719_p9 }
 0x250   : > { %p1896_p5 = pneg %p1895_p4 }
 0x252   : > { %p1901_p7 = pnand %p1899_p6, %p1896_p5 }
 0x254   : > { %1904 = shalt.err (!%p1901_p7)
}
 0x255   : > { %s1929_s22 = smov 384   ;;  %s1930_s23 = smov 24  }
 0x256   : > { %1716 = dma.vmem_to_hbm [thread:$0]  (%p1719_p9), %s1506_s11, 768, %s2460_s5, [#allocation4], %s1929_s22, %s1929_s22, %s1930_s23  }
 0x257   : > { %1910 = dma.done.wait (%p1719_p9), [#allocation4], 768  }
 0x258   : > { %1912 = vsyncadd (%p1719_p9), [#allocation4], 4294966528 }
 0x259 PF: > { %s16_s18 = sadd.s32 1, %s1915_s18  }
 0x25a   : > { %p13_p8 = scmp.ge.s32.totalorder %s16_s18, 19  }
 0x25c   :  { %15 = sbr.rel (!%p13_p8) target bundleno = 1 (0x1), region = 81 }
 0x263   :  { %1521 = vsyncpa [#allocation4], 1 }
 0x264   :  { %1523 = vsyncpa [#allocation4 + $0x1], 1 }

</bundles_post_ra>
